<compile_context>
chip_gen: v5e
topology: v5e:2x2
jax: 0.10.0
libtpu: 0.0.40
codegen_flags: <defaults>
</compile_context>

<pallas_src>
import functools

import jax
import jax.numpy as jnp
from jax import lax
from jax.experimental import pallas as pl
from jax.experimental.pallas import tpu as pltpu

NUM_CLASSES = 4
HEAD_WIDTH = 64


# ----------------------------------------------------------------------------
# pltpu.roll direction probe (resolved once at startup, outside the hot path)
# ----------------------------------------------------------------------------
_ROLL_LIKE_JNP = None  # True  -> pltpu.roll(x, s)[i] == x[(i - s) % M]  (jnp.roll)
                       # False -> pltpu.roll(x, s)[i] == x[(i + s) % M]


def _probe_roll_semantics():
    global _ROLL_LIKE_JNP

    def kernel(x_ref, o_ref):
        o_ref[...] = pltpu.roll(x_ref[...], shift=1, axis=0)

    x = lax.broadcasted_iota(jnp.float32, (8, 128), 0)
    out = pl.pallas_call(
        kernel, out_shape=jax.ShapeDtypeStruct((8, 128), jnp.float32))(x)
    v = float(out[0, 0])
    if v == 7.0:
        _ROLL_LIKE_JNP = True
    elif v == 1.0:
        _ROLL_LIKE_JNP = False
    else:
        raise RuntimeError(f"unexpected pltpu.roll semantics (probe value {v})")


def _roll_shift(off, m):
    """Static shift s.t. rolled[r] == x[(r + off) % m]."""
    if _ROLL_LIKE_JNP is None:
        raise RuntimeError("call _probe_roll_semantics() before tracing kernels")
    return (-off) % m if _ROLL_LIKE_JNP else off % m


# ----------------------------------------------------------------------------
# small in-kernel helpers (pure jnp/lax + pltpu.roll -> Mosaic-safe)
# ----------------------------------------------------------------------------
def _silu(y):
    return y * jax.nn.sigmoid(y)


def _tap_geometry(M, H, W):
    """9 static row offsets + (M,1) validity masks for a 3x3 'same' conv on the
    row-flattened NHWC map.  Computed ONCE per kernel body and reused."""
    r = lax.broadcasted_iota(jnp.int32, (M, 1), 0)
    hh = (r // W) % H
    ww = r % W
    offsets, masks = [], []
    for dh in (-1, 0, 1):
        for dw in (-1, 0, 1):
            offsets.append(dh * W + dw)
            masks.append((hh + dh >= 0) & (hh + dh < H)
                         & (ww + dw >= 0) & (ww + dw < W))
    return offsets, masks


def _conv1x1_multi(xs, w_ref, b_ref):
    """1x1 conv over implicitly channel-concatenated inputs.
    xs: list of (M, Cj) f32; w_ref: (sum Cj, Cout) bf16; b_ref: (1, Cout) f32."""
    M = xs[0].shape[0]
    Cout = w_ref.shape[1]
    acc = jnp.zeros((M, Cout), jnp.float32) + b_ref[...]
    off = 0
    for x in xs:
        C = x.shape[1]
        acc = acc + jnp.dot(x.astype(jnp.bfloat16), w_ref[off:off + C, :],
                            preferred_element_type=jnp.float32)
        off += C
    return acc


def _conv3x3_multi(xs, w_ref, b_ref, offsets, masks):
    """3x3 stride-1 'same' conv over implicitly channel-concatenated inputs.
    Each tap: pltpu.roll (XLU) + validity mask (VPU); only the weight matmul
    uses the MXU.  xs: list of (M, Cj) f32; w_ref: (9*sum Cj, Cout) bf16 in
    (kh, kw, cin) row order; b_ref: (1, Cout) f32."""
    M = xs[0].shape[0]
    Ctot = sum(x.shape[1] for x in xs)
    Cout = w_ref.shape[1]
    acc = jnp.zeros((M, Cout), jnp.float32) + b_ref[...]
    for k, (off, msk) in enumerate(zip(offsets, masks)):
        base = k * Ctot
        coff = 0
        for x in xs:
            C = x.shape[1]
            if off == 0:
                xk = x
            else:
                xk = pltpu.roll(x, shift=_roll_shift(off, M), axis=0)
                xk = jnp.where(msk, xk, 0.0)
            acc = acc + jnp.dot(xk.astype(jnp.bfloat16),
                                w_ref[base + coff:base + coff + C, :],
                                preferred_element_type=jnp.float32)
            coff += C
    return acc


# ----------------------------------------------------------------------------
# Kernel 1: im2col matmul + bias + SiLU (stride-2 backbone convs)
# ----------------------------------------------------------------------------
def _mm_act_kernel(x_ref, w_ref, b_ref, o_ref, *, act):
    acc = jnp.dot(x_ref[...], w_ref[...],
                  preferred_element_type=jnp.float32) + b_ref[...]
    if act == "silu":
        acc = acc * jax.nn.sigmoid(acc)
    elif act == "sigmoid":
        acc = jax.nn.sigmoid(acc)
    o_ref[...] = acc.astype(o_ref.dtype)


def conv_matmul(patches, w, b, act="silu"):
    """patches (M,K) bf16, w (K,Cout) bf16, b (1,Cout) f32 -> (M,Cout) bf16.
    Narrow Cout is zero-padded to 128 lanes (lane-dense stores) and sliced off
    here.  Single block at small M (no grid-step overhead on v5e/v6e); tiled
    "parallel" grid for larger M (v7x megacore)."""
    M, K = patches.shape
    Cout = w.shape[1]
    Cp = max(Cout, 128)
    if Cp != Cout:
        w = jnp.pad(w, ((0, 0), (0, Cp - Cout)))
        b = jnp.pad(b, ((0, 0), (0, Cp - Cout)))
    kern = functools.partial(_mm_act_kernel, act=act)
    if M <= 2048:
        out = pl.pallas_call(
            kern, out_shape=jax.ShapeDtypeStruct((M, Cp), jnp.bfloat16),
        )(patches, w, b)
    else:
        tile_m = 512
        Mp = pl.cdiv(M, tile_m) * tile_m
        x = patches if Mp == M else jnp.pad(patches, ((0, Mp - M), (0, 0)))
        out = pl.pallas_call(
            kern,
            out_shape=jax.ShapeDtypeStruct((Mp, Cp), jnp.bfloat16),
            grid=(Mp // tile_m,),
            in_specs=[pl.BlockSpec((tile_m, K), lambda i: (i, 0)),
                      pl.BlockSpec((K, Cp), lambda i: (0, 0)),
                      pl.BlockSpec((1, Cp), lambda i: (0, 0))],
            out_specs=pl.BlockSpec((tile_m, Cp), lambda i: (i, 0)),
            compiler_params=pltpu.CompilerParams(
                dimension_semantics=("parallel",)),
        )(x, w, b)[:M]
    return out if Cp == Cout else out[:, :Cout]


def _im2col(x_nhwc, ksize, stride):
    # TODO(synk): still wrapper-side XLA glue; in-kernel strided reads would
    # remove ~10 XLA ops per stride-2 conv.
    N, H, W, C = x_nhwc.shape
    pad = (ksize - 1) // 2
    xp = jnp.pad(x_nhwc, ((0, 0), (pad, pad), (pad, pad), (0, 0)))
    Ho = (H + 2 * pad - ksize) // stride + 1
    Wo = (W + 2 * pad - ksize) // stride + 1
    cols = []
    for kh in range(ksize):
        for kw in range(ksize):
            cols.append(
                xp[:, kh:kh + stride * Ho:stride, kw:kw + stride * Wo:stride, :])
    patches = (jnp.concatenate(cols, axis=-1)
               .reshape(N * Ho * Wo, ksize * ksize * C).astype(jnp.bfloat16))
    return patches, Ho, Wo


def conv2d_s2(x_nhwc, params, stride=2):
    """Stride-2 BaseConv (conv + folded BN + SiLU) via im2col + one matmul kernel."""
    w, b = params["w"], params["b"]
    N, H, W, C = x_nhwc.shape
    ksize = int(round((w.shape[0] // C) ** 0.5))   # static, from shapes
    patches, Ho, Wo = _im2col(x_nhwc, ksize, stride)
    out = conv_matmul(patches, w, b, act="silu")
    return out.reshape(N, Ho, Wo, -1)


# ----------------------------------------------------------------------------
# Kernel 2: fused chain of stride-1 BaseConvs (intermediates never leave VMEM)
# ----------------------------------------------------------------------------
def fused_conv_chain(feats, layers):
    """One pallas_call for a chain of stride-1 BaseConvs.  `feats` is a list of
    NHWC maps (same N,H,W) implicitly concatenated on channels as the input of
    the first layer; `layers` = [{'w': (K, Cout) bf16, 'b': (1, Cout) f32}]."""
    N, H, W = feats[0].shape[:3]
    M = N * H * W
    cins = [int(f.shape[-1]) for f in feats]
    nf = len(feats)
    nlayer = len(layers)
    c_last = layers[-1]["w"].shape[1]

    # static ksize inference from (static) weight shapes
    cur = sum(cins)
    ksizes = []
    for l in layers:
        ksizes.append(3 if l["w"].shape[0] == 9 * cur else 1)
        cur = l["w"].shape[1]
    ksizes = tuple(ksizes)
    need3 = any(k == 3 for k in ksizes)

    def kernel(*refs):
        o_ref = refs[-1]
        offsets, masks = _tap_geometry(M, H, W) if need3 else (None, None)
        xs = [refs[i][...].astype(jnp.float32) for i in range(nf)]
        for li in range(nlayer):
            w_ref = refs[nf + 2 * li]
            b_ref = refs[nf + 2 * li + 1]
            if ksizes[li] == 1:
                y = _conv1x1_multi(xs, w_ref, b_ref)
            else:
                y = _conv3x3_multi(xs, w_ref, b_ref, offsets, masks)
            xs = [_silu(y)]
        o_ref[...] = xs[0].astype(o_ref.dtype)

    args = [f.reshape(M, c) for f, c in zip(feats, cins)]
    for l in layers:
        args += [l["w"], l["b"]]
    out = pl.pallas_call(
        kernel, out_shape=jax.ShapeDtypeStruct((M, c_last), jnp.bfloat16))(*args)
    return out.reshape(N, H, W, c_last)


# ----------------------------------------------------------------------------
# Kernel 3: bottom-up PAN stage (stride-2 conv + concat + C3 conv) in ONE call
# ----------------------------------------------------------------------------
def fused_bu_stage(x_nhwc, skip_nhwc, bu_params, c3_params):
    N = x_nhwc.shape[0]
    patches, Ho, Wo = _im2col(x_nhwc, ksize=3, stride=2)
    M = N * Ho * Wo
    Cskip = skip_nhwc.shape[-1]
    c_out = c3_params["w"].shape[1]

    def kernel(p_ref, s_ref, wb_ref, bb_ref, wc_ref, bc_ref, o_ref):
        offsets, masks = _tap_geometry(M, Ho, Wo)
        bu = _silu(jnp.dot(p_ref[...], wb_ref[...],
                           preferred_element_type=jnp.float32) + bb_ref[...])
        skip = s_ref[...].astype(jnp.float32)
        y = _silu(_conv3x3_multi([bu, skip], wc_ref, bc_ref, offsets, masks))
        o_ref[...] = y.astype(o_ref.dtype)

    out = pl.pallas_call(
        kernel, out_shape=jax.ShapeDtypeStruct((M, c_out), jnp.bfloat16),
    )(patches, skip_nhwc.reshape(M, Cskip),
      bu_params["w"], bu_params["b"], c3_params["w"], c3_params["b"])
    return out.reshape(N, Ho, Wo, c_out)


# ----------------------------------------------------------------------------
# Kernel 4: fully fused YOLOX head tower + eval decode, one call per FPN level
# ----------------------------------------------------------------------------
def _head_kernel(x_ref, ws, bs, w01, b01, w12, b12, wp, bp, o_ref,
                 *, H, W, stride):
    M = x_ref.shape[0]
    offsets, masks = _tap_geometry(M, H, W)
    x = x_ref[...].astype(jnp.float32)
    xs = _silu(_conv1x1_multi([x], ws, bs))
    # fused cls/reg towers: columns [0:w] = cls branch, [w:2w] = reg branch
    cr = _silu(_conv3x3_multi([xs], w01, b01, offsets, masks))
    cr = _silu(_conv3x3_multi([cr], w12, b12, offsets, masks))  # block-diag wts
    # stacked reg/obj/cls 1x1 preds -> (M, 128) lane-dense (cols >= 9 zero wts)
    y = (jnp.dot(cr.astype(jnp.bfloat16), wp[...],
                 preferred_element_type=jnp.float32) + bp[...])

    # fused decode: (xy + grid) * stride, exp(wh) * stride, sigmoid(obj/cls)
    Cp = y.shape[1]
    r = lax.broadcasted_iota(jnp.int32, (M, 1), 0)
    xv = (r % W).astype(jnp.float32)
    yv = ((r // W) % H).astype(jnp.float32)
    col = lax.broadcasted_iota(jnp.int32, (M, Cp), 1)
    dec = jnp.where(col == 0, (y + xv) * stride,
          jnp.where(col == 1, (y + yv) * stride,
          jnp.where(col < 4, jnp.exp(y) * stride,
                    jax.nn.sigmoid(y))))
    o_ref[...] = dec


def head_level(feat_nhwc, hp, stride, num_classes=NUM_CLASSES):
    N, H, W, C = feat_nhwc.shape
    M = N * H * W
    ncol = hp["b_pred"].shape[1]   # 128 (lane-dense padded)
    out = pl.pallas_call(
        functools.partial(_head_kernel, H=H, W=W, stride=float(stride)),
        out_shape=jax.ShapeDtypeStruct((M, ncol), jnp.float32),
    )(feat_nhwc.reshape(M, C),
      hp["stem"]["w"], hp["stem"]["b"],
      hp["w01"], hp["b01"], hp["w12"], hp["b12"],
      hp["w_pred"], hp["b_pred"])
    # drop the zero-weight pad lanes (they contain sigmoid(0)=0.5 garbage)
    return out[:, :5 + num_classes].reshape(N, H * W, 5 + num_classes)


def upsample2x(x):
    # nearest-neighbour x2, NHWC (matches nn.Upsample(scale_factor=2, "nearest"))
    return jnp.repeat(jnp.repeat(x, 2, axis=1), 2, axis=2)


# ----------------------------------------------------------------------------
# Deterministic parameter construction (synthetic weights; BN folded; bf16)
# ----------------------------------------------------------------------------
class ParamBank:
    def __init__(self, key):
        self.key, self.i = key, 0

    def conv(self, cin, cout, ksize):
        kw = jax.random.fold_in(self.key, self.i); self.i += 1
        kb = jax.random.fold_in(self.key, self.i); self.i += 1
        fan_in = cin * ksize * ksize
        w = jax.random.normal(kw, (ksize * ksize * cin, cout), jnp.float32)
        w = w * (1.0 / jnp.sqrt(jnp.float32(fan_in)))
        b = 0.02 * jax.random.normal(kb, (1, cout), jnp.float32)
        return {"w": w.astype(jnp.bfloat16), "b": b}   # bf16 wts, f32 bias


def build_params(key, num_classes=NUM_CLASSES, width=HEAD_WIDTH):
    pb = ParamBank(key)
    p = {}
    # backbone stages (CSPDarknet, depth reduced to one fused conv per stage)
    p["stem"] = pb.conv(3, 16, 3)
    p["dark2"] = pb.conv(16, 32, 3)
    p["dark3"] = pb.conv(32, 64, 3)      # -> C3 (stride 8)
    p["dark4"] = pb.conv(64, 128, 3)     # -> C4 (stride 16)
    p["dark5"] = pb.conv(128, 128, 3)    # -> C5 (stride 32)
    # PAFPN
    p["lateral_conv0"] = pb.conv(128, 64, 1)
    p["C3_p4"] = pb.conv(64 + 128, 64, 3)
    p["reduce_conv1"] = pb.conv(64, 64, 1)
    p["C3_p3"] = pb.conv(64 + 64, 64, 3)
    p["bu_conv2"] = pb.conv(64, 64, 3)
    p["C3_n3"] = pb.conv(64 + 64, 64, 3)
    p["bu_conv1"] = pb.conv(64, 64, 3)
    p["C3_n4"] = pb.conv(64 + 64, 64, 3)
    # YOLOXHead (per level), pre-fused:
    #   w01: c0/r0 share input xs -> concat on Cout           (9*w, 2w)
    #   w12: c1/r1 block-diagonal on the [cls|reg] features   (9*2w, 2w)
    #   w_pred/b_pred: stacked reg/obj/cls 1x1 preds, padded to 128 lanes
    head = []
    for _ in range(3):
        stem = pb.conv(64, width, 1)
        c0, c1 = pb.conv(width, width, 3), pb.conv(width, width, 3)
        r0, r1 = pb.conv(width, width, 3), pb.conv(width, width, 3)
        cls_p = pb.conv(width, num_classes, 1)
        reg_p = pb.conv(width, 4, 1)
        obj_p = pb.conv(width, 1, 1)

        w01 = jnp.concatenate(
            [jnp.concatenate([c0["w"][k * width:(k + 1) * width],
                              r0["w"][k * width:(k + 1) * width]], axis=1)
             for k in range(9)], axis=0)
        b01 = jnp.concatenate([c0["b"], r0["b"]], axis=1)

        zero = jnp.zeros((width, width), jnp.bfloat16)
        w12 = jnp.concatenate(
            [jnp.concatenate(
                [jnp.concatenate([c1["w"][k * width:(k + 1) * width], zero], axis=1),
                 jnp.concatenate([zero, r1["w"][k * width:(k + 1) * width]], axis=1)],
                axis=0)
             for k in range(9)], axis=0)
        b12 = jnp.concatenate([c1["b"], r1["b"]], axis=1)

        w_pred = jnp.zeros((2 * width, 128), jnp.bfloat16)
        w_pred = w_pred.at[:width, 5:5 + num_classes].set(cls_p["w"])
        w_pred = w_pred.at[width:, 0:4].set(reg_p["w"])
        w_pred = w_pred.at[width:, 4:5].set(obj_p["w"])
        b_pred = jnp.zeros((1, 128), jnp.float32)
        b_pred = b_pred.at[:, 0:4].set(reg_p["b"])
        b_pred = b_pred.at[:, 4:5].set(obj_p["b"])
        b_pred = b_pred.at[:, 5:5 + num_classes].set(cls_p["b"])

        head.append({"stem": stem, "w01": w01, "b01": b01,
                     "w12": w12, "b12": b12,
                     "w_pred": w_pred, "b_pred": b_pred})
    p["head"] = head
    return p


# ----------------------------------------------------------------------------
# YOLOX forward: fpn_outs = backbone(x); outputs = head(fpn_outs) (+ decode)
# ----------------------------------------------------------------------------
def yolox_forward(params, x_nchw):
    x = jnp.transpose(x_nchw, (0, 2, 3, 1))                 # NCHW -> NHWC

    # ---- backbone: stride-2 convs (im2col + single-block matmul kernel) ----
    s = conv2d_s2(x, params["stem"])
    d2 = conv2d_s2(s, params["dark2"])
    c3 = conv2d_s2(d2, params["dark3"])
    c4 = conv2d_s2(c3, params["dark4"])
    c5 = conv2d_s2(c4, params["dark5"])

    # ---- PAFPN top-down (fused stride-1 chains, implicit channel concat) ----
    fpn_out0 = fused_conv_chain([c5], [params["lateral_conv0"]])
    fpn_out1 = fused_conv_chain([upsample2x(fpn_out0), c4],
                                [params["C3_p4"], params["reduce_conv1"]])
    pan_out2 = fused_conv_chain([upsample2x(fpn_out1), c3], [params["C3_p3"]])

    # ---- PAFPN bottom-up: stride-2 conv + concat + C3 conv, ONE call each ----
    pan_out1 = fused_bu_stage(pan_out2, fpn_out1,
                              params["bu_conv2"], params["C3_n3"])
    pan_out0 = fused_bu_stage(pan_out1, fpn_out0,
                              params["bu_conv1"], params["C3_n4"])

    # ---- YOLOXHead + decode, one fused kernel per level ----
    # TODO(synk): batch the three levels into one grid=(3,) "parallel" call for
    # v7x megacore; on single-TC v5e/v6e separate calls are already optimal.
    outs = [head_level(f, params["head"][i], st)
            for i, (f, st) in enumerate(
                zip((pan_out2, pan_out1, pan_out0), (8, 16, 32)))]
    return jnp.concatenate(outs, axis=1)     # (N, anchors, 5 + num_classes)


if __name__ == "__main__":
    _probe_roll_semantics()

    key = jax.random.PRNGKey(0)

    # --- self-check: roll-based 3x3 'same' conv vs lax.conv_general_dilated ---
    xc = jax.random.normal(jax.random.fold_in(key, 7), (1, 8, 8, 32), jnp.float32)
    pc = ParamBank(jax.random.fold_in(key, 8)).conv(32, 64, 3)
    got = fused_conv_chain([xc], [pc]).astype(jnp.float32)
    xr = xc.astype(jnp.bfloat16).astype(jnp.float32)   # kernel feeds the MXU bf16
    wf = pc["w"].astype(jnp.float32).reshape(3, 3, 32, 64)
    ref = lax.conv_general_dilated(
        xr, wf, (1, 1), "SAME",
        dimension_numbers=("NHWC", "HWIO", "NHWC"),
        precision=lax.Precision.HIGHEST)
    ref = ref + pc["b"].reshape(1, 1, 1, 64)
    ref = ref * jax.nn.sigmoid(ref)
    err = float(jnp.max(jnp.abs(got - ref)))
    assert err < 0.06, f"3x3 conv self-check failed (max abs err {err})"

    params = build_params(jax.random.fold_in(key, 1))
    # NCHW input (PyTorch convention): batch=2, RGB, 64x64 (head strides 8/16/32)
    x = jax.random.normal(jax.random.fold_in(key, 2), (2, 3, 64, 64), jnp.float32)

    fwd = jax.jit(yolox_forward)
    out = jax.block_until_ready(fwd(params, x))

    n_anchors = 8 * 8 + 4 * 4 + 2 * 2  # 84
    assert out.shape == (2, n_anchors, 5 + NUM_CLASSES), out.shape
    assert bool(jnp.all(jnp.isfinite(out)))
    print("KERNEL_OK")
</pallas_src>

<mosaic_0001>
module attributes {stable_mosaic.version = 11 : i64} {
  func.func @kernel(%arg0: memref<8x128xf32, #tpu.memory_space<vmem>>, %arg1: memref<8x128xf32, #tpu.memory_space<vmem>>) attributes {dimension_semantics = [], scalar_prefetch = 0 : i64, scratch_operands = 0 : i64, tpu.core_type = #tpu.core_type<tc>} {
    %c0 = arith.constant 0 : index
    %c0_0 = arith.constant 0 : index
    %0 = vector.load %arg0[%c0, %c0_0] : memref<8x128xf32, #tpu.memory_space<vmem>>, vector<8x128xf32>
    %c1_i32 = arith.constant 1 : i32
    %1 = tpu.dynamic_rotate %0 by %c1_i32 dim 0 : vector<8x128xf32>, i32 -> vector<8x128xf32>
    %c0_1 = arith.constant 0 : index
    %c0_2 = arith.constant 0 : index
    %2 = vector.load %arg1[%c0_1, %c0_2] : memref<8x128xf32, #tpu.memory_space<vmem>>, vector<8x128xf32>
    tpu.vector_store %arg1[%c0_1, %c0_2], %1 {strides = array<i32>} : memref<8x128xf32, #tpu.memory_space<vmem>>, vector<8x128xf32>,
    return
  }
}

</mosaic_0001>

<bundles_post_ra>
// kernel: tpu_custom_call.1
= control target key start
LH: loop header
LB: loop body
LE: loop exit
PB: predicated region body
PF: predicated region fallthrough
CT: control target
= control target key end

     0   :  { %6 = vsyncpa [#allocation3], 0  ;;  %s115_s0 = inlined_call_operand.hbm [shape: f32[8,128], index: 0, kind: input, shape index: {}]   ;;  %s116_s1 = inlined_call_operand.hbm [shape: f32[8,128], index: 1, kind: output, shape index: {}]  }
   0x1   :  { %7 = vsyncpa [#allocation4], 0  ;;  %s13_s8 = sshll.u32 %s115_s0, 4  ;;  %s97_s9 = smov [#allocation2]   ;;  %s14_s8 = int_to_ptr.hbm [resolvable:$true] %s13_s8 }
   0x2   :  { %s15_s10 = sshll.u32 %s97_s9, 4  ;;  %s16_s10 = int_to_ptr.vmem [resolvable:$true] %s15_s10 }
   0x3   :  { %18 = dma.hbm_to_vmem [thread:$0]  %s14_s8, 128, %s16_s10, [#allocation3]  }
   0x4   :  { %93 = dma.done.wait [#allocation3], 128  }
   0x5   :  { %94 = vsyncadd [#allocation3], 4294967168  ;;  %s98_s11 = smov [#allocation5]   ;;  %s33_s15 = sshll.u32 %s116_s1, 4  ;;  %v23_v0 = vld [vmem:[#allocation2] sm:$0xff]  ;;  %s34_s15 = int_to_ptr.hbm [resolvable:$true] %s33_s15 }
   0x6   :  { %s31_s12 = sshll.u32 %s98_s11, 4  ;;  %v24_v1 = vrot.slane %v23_v0, 7  ;;  %s32_s12 = int_to_ptr.vmem [resolvable:$true] %s31_s12 }
   0x8   :  { %25 = vst [vmem:[#allocation5] sm:$0xff] %v24_v1 }
   0x9   :  { %36 = dma.vmem_to_hbm [thread:$0]  %s32_s12, 128, %s34_s15, [#allocation4]  }
   0xa   :  { %95 = dma.done.wait [#allocation4], 128  }
   0xb   :  { %96 = vsyncadd [#allocation4], 4294967168 }
   0xc   :  { %41 = vsyncpa [#allocation3], 1 }
   0xd   :  { %42 = vsyncpa [#allocation4], 1 }

</bundles_post_ra>
